<compile_context>
chip_gen: v5e
topology: v5e:2x2
jax: 0.10.0
libtpu: 0.0.40
codegen_flags: <defaults>
</compile_context>

<pallas_src>
import functools

import jax
import jax.numpy as jnp
import numpy as np
from jax.experimental import pallas as pl
from jax.experimental.pallas import tpu as pltpu


def _dino_loss_kernel(temp_ref, student_ref, teacher_ref, center_ref,
                      loss_ref, new_center_ref,
                      q_scr, acc_ref,
                      *, batch: int, num_crops: int, tile_b: int,
                      n_row_tiles: int, inv_student_temp: float,
                      center_momentum: float):
    v = pl.program_id(0)          # crop index
    rb = pl.program_id(1)         # row-tile index inside the crop
    is_first = jnp.logical_and(v == 0, rb == 0)
    is_last = jnp.logical_and(v == num_crops - 1, rb == n_row_tiles - 1)

    # ---- first grid step: teacher softmax + q_sum + center EMA (resident) ---
    @pl.when(is_first)
    def _teacher_pass():
        acc_ref[0] = jnp.float32(0.0)

        inv_temp = 1.0 / temp_ref[0]                        # scalar reciprocal
        teacher = teacher_ref[...].astype(jnp.float32)      # (2B, D)
        center = center_ref[...].astype(jnp.float32)        # (1, D)

        t = (teacher - center) * inv_temp
        t_max = jnp.max(t, axis=-1, keepdims=True)
        t_exp = jnp.exp(t - t_max)
        denom = jnp.sum(t_exp, axis=-1, keepdims=True)
        q = t_exp * pl.reciprocal(denom)                    # exact; 1 recip/row

        q0 = q[:batch, :]
        q1 = q[batch:, :]
        q_scr[0:batch, :] = q0
        q_scr[batch:2 * batch, :] = q1
        q_scr[2 * batch:3 * batch, :] = q0 + q1             # q_sum for local crops

        # center EMA fused into the same teacher pass
        batch_center = jnp.sum(teacher, axis=0, keepdims=True) * jnp.float32(
            1.0 / (2 * batch))
        new_center_ref[...] = (center * jnp.float32(center_momentum)
                               + batch_center * jnp.float32(1.0 - center_momentum))

    # ---- student log-softmax fused with CE for this (crop, row-tile) --------
    s = student_ref[...].astype(jnp.float32) * jnp.float32(inv_student_temp)
    s_max = jnp.max(s, axis=-1, keepdims=True)
    s_shift = s - s_max
    lse = jnp.log(jnp.sum(jnp.exp(s_shift), axis=-1, keepdims=True))
    logp = s_shift - lse                                     # (tile_b, D)

    # teacher weights: crop 0 -> q1, crop 1 -> q0, local crops -> q0 + q1
    q_idx = jnp.where(v == 0, 1, jnp.where(v == 1, 0, 2))
    row_off = pl.multiple_of(q_idx * batch + rb * tile_b, tile_b)
    w = q_scr[pl.ds(row_off, tile_b), :]

    acc_ref[0] += jnp.sum(w * logp)

    # ---- last grid step: negate once and normalize ---------------------------
    @pl.when(is_last)
    def _finalize():
        n_terms = 2 * (num_crops - 1)
        loss_ref[0, 0] = -acc_ref[0] / jnp.float32(n_terms * batch)


def _pick_row_tile(batch: int, feat_dim: int, itemsize: int = 4,
                   target_bytes: int = 4 << 20) -> int:
    """Largest row tile that divides `batch`, is a multiple of 8 when possible,
    and keeps tile_b * D * 4B around ~4 MiB (safe on v5e/v6e/v7x VMEM budgets
    with double-buffering)."""
    max_rows = max(1, target_bytes // (feat_dim * itemsize))
    if batch <= max_rows:
        return batch
    best = 0
    t = 8
    while t <= min(batch, max_rows):
        if batch % t == 0:
            best = t
        t += 8
    return best if best > 0 else batch


def dino_loss(student_output, teacher_output, center, epoch,
              teacher_temp_schedule, *, num_crops: int,
              student_temp: float = 0.1, center_momentum: float = 0.9):
    """Returns (total_loss scalar, updated center (1, D)).

    student/teacher may be f32 or bf16; the kernel upcasts to f32 internally.
    `batch` (rows per crop) should preferably be a multiple of 8 so chunk
    slices stay sublane-aligned.
    """
    total_rows, out_dim = student_output.shape
    assert total_rows % num_crops == 0
    batch = total_rows // num_crops
    assert teacher_output.shape == (2 * batch, out_dim)
    assert center.shape == (1, out_dim)

    tile_b = _pick_row_tile(batch, out_dim)
    assert batch % tile_b == 0
    n_rt = batch // tile_b

    # schedule lookup (plain JAX glue)
    temp = teacher_temp_schedule[epoch].reshape(1).astype(jnp.float32)

    kernel = functools.partial(
        _dino_loss_kernel,
        batch=batch, num_crops=num_crops, tile_b=tile_b, n_row_tiles=n_rt,
        inv_student_temp=1.0 / student_temp, center_momentum=center_momentum)

    grid_spec = pltpu.PrefetchScalarGridSpec(
        num_scalar_prefetch=0,
        grid=(num_crops, n_rt),
        in_specs=[
            pl.BlockSpec(memory_space=pltpu.MemorySpace.SMEM),          # temp
            pl.BlockSpec((tile_b, out_dim),                             # student tile
                         lambda v, rb: (v * n_rt + rb, 0)),
            pl.BlockSpec((2 * batch, out_dim), lambda v, rb: (0, 0)),   # teacher (resident)
            pl.BlockSpec((1, out_dim), lambda v, rb: (0, 0)),           # center (resident)
        ],
        out_specs=(
            pl.BlockSpec(memory_space=pltpu.MemorySpace.SMEM),          # loss scalar
            pl.BlockSpec((1, out_dim), lambda v, rb: (0, 0)),           # new center
        ),
        scratch_shapes=[
            pltpu.VMEM((3 * batch, out_dim), jnp.float32),              # q0 | q1 | q_sum
            pltpu.SMEM((1,), jnp.float32),                              # CE accumulator
        ],
    )

    # NOTE: input_output_aliases={3: 0-indexed output 1} was considered to
    # alias `center` -> new_center, but is skipped to avoid donating a buffer
    # the caller still reads; the (1, D) writeback is negligible.
    loss, new_center = pl.pallas_call(
        kernel,
        out_shape=(jax.ShapeDtypeStruct((1, 1), jnp.float32),
                   jax.ShapeDtypeStruct((1, out_dim), jnp.float32)),
        grid_spec=grid_spec,
        compiler_params=pltpu.CompilerParams(
            # Accumulator + resident teacher scratch carried across the grid,
            # so both axes are "arbitrary".
            # TODO(synk): emit per-crop partial losses to allow "parallel" on
            #             v7x's two TensorCores.
            dimension_semantics=("arbitrary", "arbitrary"),
            vmem_limit_bytes=32 * 1024 * 1024),
    )(temp, student_output, teacher_output, center)
    return loss[0, 0], new_center


def _reference(student_output, teacher_output, center, temp,
               num_crops, student_temp, center_momentum):
    """Pure-JAX reference reproducing the PyTorch semantics."""
    batch = student_output.shape[0] // num_crops
    s = student_output.astype(jnp.float32) / student_temp
    student_chunks = [s[v * batch:(v + 1) * batch] for v in range(num_crops)]
    t = (teacher_output.astype(jnp.float32) - center) / temp
    q_all = jax.nn.softmax(t, axis=-1)
    teacher_chunks = [q_all[i * batch:(i + 1) * batch] for i in range(2)]
    total, n = 0.0, 0
    for iq, q in enumerate(teacher_chunks):
        for v in range(num_crops):
            if v == iq:
                continue
            lp = jax.nn.log_softmax(student_chunks[v], axis=-1)
            total = total + jnp.mean(jnp.sum(-q * lp, axis=-1))
            n += 1
    total = total / n
    bc = jnp.sum(teacher_output, axis=0, keepdims=True) / teacher_output.shape[0]
    new_center = center * center_momentum + bc * (1 - center_momentum)
    return total, new_center


if __name__ == "__main__":
    # Module config (synthetic, deterministic, SMALL shapes for CI).
    # NOTE: tile-size / pipelining wins only show up at production shapes
    # (out_dim in the thousands, 10 crops); this harness is a correctness check.
    out_dim = 128
    warmup_teacher_temp = 0.04
    teacher_temp = 0.07
    warmup_teacher_temp_iters = 10
    total_iters = 30
    num_crops = 4
    student_temp = 0.1
    center_momentum = 0.9
    batch = 8

    schedule = jnp.asarray(np.concatenate((
        np.linspace(warmup_teacher_temp, teacher_temp, warmup_teacher_temp_iters),
        np.ones(total_iters - warmup_teacher_temp_iters) * teacher_temp,
    )), dtype=jnp.float32)

    key = jax.random.PRNGKey(0)
    k1, k2 = jax.random.split(key)
    student_output = jax.random.normal(k1, (num_crops * batch, out_dim),
                                       dtype=jnp.float32)
    teacher_output = jax.random.normal(k2, (2 * batch, out_dim),
                                       dtype=jnp.float32)
    center = jnp.zeros((1, out_dim), dtype=jnp.float32)  # as in __init__
    epoch = jnp.int32(5)

    loss, new_center = dino_loss(
        student_output, teacher_output, center, epoch, schedule,
        num_crops=num_crops, student_temp=student_temp,
        center_momentum=center_momentum)
    jax.block_until_ready((loss, new_center))

    # Correctness check against a pure-JAX reference of the PyTorch forward.
    ref_loss, ref_center = _reference(
        student_output, teacher_output, center, schedule[epoch],
        num_crops, student_temp, center_momentum)
    assert jnp.allclose(loss, ref_loss, rtol=1e-5, atol=1e-5), (loss, ref_loss)
    assert jnp.allclose(new_center, ref_center, rtol=1e-5, atol=1e-5)

    print("KERNEL_OK")
</pallas_src>

<mosaic_0001>
module attributes {stable_mosaic.version = 11 : i64} {
  func.func @_dino_loss_kernel(%arg0: i32, %arg1: i32, %arg2: memref<1xf32, #tpu.memory_space<smem>>, %arg3: memref<8x128xf32, #tpu.memory_space<vmem>>, %arg4: memref<16x128xf32, #tpu.memory_space<vmem>>, %arg5: memref<1x128xf32, #tpu.memory_space<vmem>>, %arg6: memref<1x1xf32, #tpu.memory_space<smem>>, %arg7: memref<1x128xf32, #tpu.memory_space<vmem>>, %arg8: memref<24x128xf32, #tpu.memory_space<vmem>>, %arg9: memref<1xf32, #tpu.memory_space<smem>>) attributes {dimension_semantics = [#tpu.dimension_semantics<arbitrary>, #tpu.dimension_semantics<arbitrary>], iteration_bounds = array<i64: 4, 1>, scalar_prefetch = 0 : i64, scratch_operands = 2 : i64, tpu.core_type = #tpu.core_type<tc>, window_params = [{transform_indices = @transform_0, window_bounds = array<i64: 1>}, {transform_indices = @transform_1, window_bounds = array<i64: 8, 128>}, {pipeline_mode = #tpu.pipeline_mode<synchronous>, transform_indices = @transform_2, window_bounds = array<i64: 16, 128>}, {pipeline_mode = #tpu.pipeline_mode<synchronous>, transform_indices = @transform_3, window_bounds = array<i64: 1, 128>}, {transform_indices = @transform_4, window_bounds = array<i64: 1, 1>}, {pipeline_mode = #tpu.pipeline_mode<synchronous>, transform_indices = @transform_5, window_bounds = array<i64: 1, 128>}]} {
    %c0_i32 = arith.constant 0 : i32
    %0 = arith.cmpi eq, %arg0, %c0_i32 : i32
    %c0_i32_0 = arith.constant 0 : i32
    %1 = arith.cmpi eq, %arg1, %c0_i32_0 : i32
    %2 = arith.andi %0, %1 : i1
    %c3_i32 = arith.constant 3 : i32
    %3 = arith.cmpi eq, %arg0, %c3_i32 : i32
    %c0_i32_1 = arith.constant 0 : i32
    %4 = arith.cmpi eq, %arg1, %c0_i32_1 : i32
    %5 = arith.andi %3, %4 : i1
    %6 = arith.extui %2 : i1 to i32
    %c0_i32_2 = arith.constant 0 : i32
    %7 = arith.cmpi ne, %6, %c0_i32_2 : i32
    scf.if %7 {
      %cst_15 = arith.constant 0.000000e+00 : f32
      %c0_16 = arith.constant 0 : index
      %41 = memref.load %arg9[%c0_16] : memref<1xf32, #tpu.memory_space<smem>>
      memref.store %cst_15, %arg9[%c0_16] : memref<1xf32, #tpu.memory_space<smem>>
      %c0_17 = arith.constant 0 : index
      %42 = memref.load %arg2[%c0_17] : memref<1xf32, #tpu.memory_space<smem>>
      %cst_18 = arith.constant 1.000000e+00 : f32
      %43 = arith.divf %cst_18, %42 : f32
      %c0_19 = arith.constant 0 : index
      %c0_20 = arith.constant 0 : index
      %44 = vector.load %arg4[%c0_19, %c0_20] : memref<16x128xf32, #tpu.memory_space<vmem>>, vector<16x128xf32>
      %c0_21 = arith.constant 0 : index
      %c0_22 = arith.constant 0 : index
      %45 = vector.load %arg5[%c0_21, %c0_22] : memref<1x128xf32, #tpu.memory_space<vmem>>, vector<1x128xf32>
      %46 = vector.broadcast %45 : vector<1x128xf32> to vector<16x128xf32>
      %47 = arith.subf %44, %46 : vector<16x128xf32>
      %48 = vector.broadcast %43 : f32 to vector<16x128xf32>
      %49 = arith.mulf %47, %48 : vector<16x128xf32>
      %cst_23 = arith.constant dense<0xFF800000> : vector<16xf32>
      %50 = vector.multi_reduction <maximumf>, %49, %cst_23 [1] : vector<16x128xf32> to vector<16xf32>
      %51 = vector.shape_cast %50 : vector<16xf32> to vector<16x1xf32>
      %52 = vector.broadcast %51 : vector<16x1xf32> to vector<16x128xf32>
      %53 = arith.subf %49, %52 : vector<16x128xf32>
      %54 = math.exp %53 : vector<16x128xf32>
      %cst_24 = arith.constant dense<0.000000e+00> : vector<16xf32>
      %55 = vector.multi_reduction <add>, %54, %cst_24 [1] : vector<16x128xf32> to vector<16xf32>
      %56 = vector.shape_cast %55 : vector<16xf32> to vector<16x1xf32>
      %57 = tpu.reciprocal %56 : vector<16x1xf32> -> vector<16x1xf32>
      %58 = vector.broadcast %57 : vector<16x1xf32> to vector<16x128xf32>
      %59 = arith.mulf %54, %58 : vector<16x128xf32>
      %60 = vector.extract_strided_slice %59 {offsets = [0, 0], sizes = [8, 128], strides = [1, 1]} : vector<16x128xf32> to vector<8x128xf32>
      %61 = vector.extract_strided_slice %59 {offsets = [8, 0], sizes = [8, 128], strides = [1, 1]} : vector<16x128xf32> to vector<8x128xf32>
      %c0_25 = arith.constant 0 : index
      %c0_26 = arith.constant 0 : index
      %62 = vector.load %arg8[%c0_25, %c0_26] : memref<24x128xf32, #tpu.memory_space<vmem>>, vector<8x128xf32>
      tpu.vector_store %arg8[%c0_25, %c0_26], %60 {strides = array<i32>} : memref<24x128xf32, #tpu.memory_space<vmem>>, vector<8x128xf32>,
      %c8 = arith.constant 8 : index
      %c0_27 = arith.constant 0 : index
      %63 = vector.load %arg8[%c8, %c0_27] : memref<24x128xf32, #tpu.memory_space<vmem>>, vector<8x128xf32>
      tpu.vector_store %arg8[%c8, %c0_27], %61 {strides = array<i32>} : memref<24x128xf32, #tpu.memory_space<vmem>>, vector<8x128xf32>,
      %64 = arith.addf %60, %61 : vector<8x128xf32>
      %c16 = arith.constant 16 : index
      %c0_28 = arith.constant 0 : index
      %65 = vector.load %arg8[%c16, %c0_28] : memref<24x128xf32, #tpu.memory_space<vmem>>, vector<8x128xf32>
      tpu.vector_store %arg8[%c16, %c0_28], %64 {strides = array<i32>} : memref<24x128xf32, #tpu.memory_space<vmem>>, vector<8x128xf32>,
      %cst_29 = arith.constant dense<0.000000e+00> : vector<128xf32>
      %66 = vector.multi_reduction <add>, %44, %cst_29 [0] : vector<16x128xf32> to vector<128xf32>
      %67 = vector.shape_cast %66 : vector<128xf32> to vector<1x128xf32>
      %cst_30 = arith.constant 6.250000e-02 : f32
      %68 = vector.broadcast %cst_30 : f32 to vector<1x128xf32>
      %69 = arith.mulf %67, %68 : vector<1x128xf32>
      %cst_31 = arith.constant 0.899999976 : f32
      %70 = vector.broadcast %cst_31 : f32 to vector<1x128xf32>
      %71 = arith.mulf %45, %70 : vector<1x128xf32>
      %cst_32 = arith.constant 1.000000e-01 : f32
      %72 = vector.broadcast %cst_32 : f32 to vector<1x128xf32>
      %73 = arith.mulf %69, %72 : vector<1x128xf32>
      %74 = arith.addf %71, %73 : vector<1x128xf32>
      %c0_33 = arith.constant 0 : index
      %c0_34 = arith.constant 0 : index
      %75 = vector.load %arg7[%c0_33, %c0_34] : memref<1x128xf32, #tpu.memory_space<vmem>>, vector<1x128xf32>
      tpu.vector_store %arg7[%c0_33, %c0_34], %74 {strides = array<i32>} : memref<1x128xf32, #tpu.memory_space<vmem>>, vector<1x128xf32>,
    } else {
    }
    %c0 = arith.constant 0 : index
    %c0_3 = arith.constant 0 : index
    %8 = vector.load %arg3[%c0, %c0_3] : memref<8x128xf32, #tpu.memory_space<vmem>>, vector<8x128xf32>
    %cst = arith.constant 1.000000e+01 : f32
    %9 = vector.broadcast %cst : f32 to vector<8x128xf32>
    %10 = arith.mulf %8, %9 : vector<8x128xf32>
    %cst_4 = arith.constant dense<0xFF800000> : vector<8xf32>
    %11 = vector.multi_reduction <maximumf>, %10, %cst_4 [1] : vector<8x128xf32> to vector<8xf32>
    %12 = vector.shape_cast %11 : vector<8xf32> to vector<8x1xf32>
    %13 = vector.broadcast %12 : vector<8x1xf32> to vector<8x128xf32>
    %14 = arith.subf %10, %13 : vector<8x128xf32>
    %15 = math.exp %14 : vector<8x128xf32>
    %cst_5 = arith.constant dense<0.000000e+00> : vector<8xf32>
    %16 = vector.multi_reduction <add>, %15, %cst_5 [1] : vector<8x128xf32> to vector<8xf32>
    %17 = vector.shape_cast %16 : vector<8xf32> to vector<8x1xf32>
    %18 = math.log %17 : vector<8x1xf32>
    %19 = vector.broadcast %18 : vector<8x1xf32> to vector<8x128xf32>
    %20 = arith.subf %14, %19 : vector<8x128xf32>
    %c0_i32_6 = arith.constant 0 : i32
    %21 = arith.cmpi eq, %arg0, %c0_i32_6 : i32
    %c1_i32 = arith.constant 1 : i32
    %22 = arith.cmpi eq, %arg0, %c1_i32 : i32
    %c0_i32_7 = arith.constant 0 : i32
    %c2_i32 = arith.constant 2 : i32
    %23 = arith.select %22, %c0_i32_7, %c2_i32 : i32
    %c1_i32_8 = arith.constant 1 : i32
    %24 = arith.select %21, %c1_i32_8, %23 : i32
    %c8_i32 = arith.constant 8 : i32
    %25 = arith.muli %24, %c8_i32 : i32
    %c8_i32_9 = arith.constant 8 : i32
    %26 = arith.muli %arg1, %c8_i32_9 : i32
    %27 = arith.addi %25, %26 : i32
    %28 = tpu.assume_multiple %27, 8 : i32
    %29 = arith.index_cast %28 : i32 to index
    %c0_10 = arith.constant 0 : index
    %30 = vector.load %arg8[%29, %c0_10] : memref<24x128xf32, #tpu.memory_space<vmem>>, vector<8x128xf32>
    %c0_11 = arith.constant 0 : index
    %31 = memref.load %arg9[%c0_11] : memref<1xf32, #tpu.memory_space<smem>>
    %32 = arith.mulf %30, %20 : vector<8x128xf32>
    %33 = vector.shape_cast %32 : vector<8x128xf32> to vector<1x8x128xf32>
    %cst_12 = arith.constant dense<0.000000e+00> : vector<1xf32>
    %34 = vector.multi_reduction <add>, %33, %cst_12 [1, 2] : vector<1x8x128xf32> to vector<1xf32>
    %35 = vector.shape_cast %34 : vector<1xf32> to vector<1x1x1xf32>
    %36 = vector.extract %35[0, 0, 0] : f32 from vector<1x1x1xf32>
    %37 = arith.addf %31, %36 : f32
    %c0_13 = arith.constant 0 : index
    %38 = memref.load %arg9[%c0_13] : memref<1xf32, #tpu.memory_space<smem>>
    memref.store %37, %arg9[%c0_13] : memref<1xf32, #tpu.memory_space<smem>>
    %39 = arith.extui %5 : i1 to i32
    %c0_i32_14 = arith.constant 0 : i32
    %40 = arith.cmpi ne, %39, %c0_i32_14 : i32
    scf.if %40 {
      %c0_15 = arith.constant 0 : index
      %41 = memref.load %arg9[%c0_15] : memref<1xf32, #tpu.memory_space<smem>>
      %cst_16 = arith.constant 0.000000e+00 : f32
      %42 = arith.subf %cst_16, %41 : f32
      %cst_17 = arith.constant 4.800000e+01 : f32
      %43 = arith.divf %42, %cst_17 : f32
      %c0_18 = arith.constant 0 : index
      %c0_19 = arith.constant 0 : index
      %44 = memref.load %arg6[%c0_18, %c0_19] : memref<1x1xf32, #tpu.memory_space<smem>>
      memref.store %43, %arg6[%c0_18, %c0_19] : memref<1x1xf32, #tpu.memory_space<smem>>
    } else {
    }
    return
  }
  func.func @transform_0(%arg0: i32, %arg1: i32) -> i32 {
    %c0_i32 = arith.constant 0 : i32
    %c0_i32_0 = arith.constant 0 : i32
    return %c0_i32 : i32
  }
  func.func @transform_1(%arg0: i32, %arg1: i32) -> (i32, i32) {
    %c1_i32 = arith.constant 1 : i32
    %0 = arith.muli %arg0, %c1_i32 : i32
    %1 = arith.addi %0, %arg1 : i32
    %c0_i32 = arith.constant 0 : i32
    %c0_i32_0 = arith.constant 0 : i32
    return %1, %c0_i32 : i32, i32
  }
  func.func @transform_2(%arg0: i32, %arg1: i32) -> (i32, i32) {
    %c0_i32 = arith.constant 0 : i32
    %c0_i32_0 = arith.constant 0 : i32
    %c0_i32_1 = arith.constant 0 : i32
    return %c0_i32, %c0_i32_0 : i32, i32
  }
  func.func @transform_3(%arg0: i32, %arg1: i32) -> (i32, i32) {
    %c0_i32 = arith.constant 0 : i32
    %c0_i32_0 = arith.constant 0 : i32
    %c0_i32_1 = arith.constant 0 : i32
    return %c0_i32, %c0_i32_0 : i32, i32
  }
  func.func @transform_4(%arg0: i32, %arg1: i32) -> (i32, i32) {
    %c0_i32 = arith.constant 0 : i32
    %c0_i32_0 = arith.constant 0 : i32
    %c0_i32_1 = arith.constant 0 : i32
    return %c0_i32, %c0_i32_0 : i32, i32
  }
  func.func @transform_5(%arg0: i32, %arg1: i32) -> (i32, i32) {
    %c0_i32 = arith.constant 0 : i32
    %c0_i32_0 = arith.constant 0 : i32
    %c0_i32_1 = arith.constant 0 : i32
    return %c0_i32, %c0_i32_0 : i32, i32
  }
}

</mosaic_0001>

<bundles_post_ra>
// kernel: tpu_custom_call.1
= control target key start
LH: loop header
LB: loop body
LE: loop exit
PB: predicated region body
PF: predicated region fallthrough
CT: control target
= control target key end

     0   :  { %s1007_s0 = inlined_call_operand.<no memory space> [shape: f32[1], index: 0, kind: input, shape index: {}]   ;;  %s1008_s1 = inlined_call_operand.hbm [shape: f32[32,128], index: 1, kind: input, shape index: {}]   ;;  %s1009_s2 = inlined_call_operand.hbm [shape: f32[16,128], index: 2, kind: input, shape index: {}]   ;;  %s1010_s3 = inlined_call_operand.vmem [shape: f32[1,128], index: 3, kind: input, shape index: {}]   ;;  %s1011_s4 = inlined_call_operand.hbm [shape: f32[1,1], index: 4, kind: output, shape index: {0}]   ;;  %s1012_s5 = inlined_call_operand.hbm [shape: f32[1,128], index: 5, kind: output, shape index: {1}]  }
   0x1   :  { %11 = sst [smem:[#allocation4]] %s1007_s0 }
   0x2   :  { %12 = vsyncpa [#allocation6], 0 }
   0x3   :  { %14 = vsyncpa [#allocation6 + $0x1], 0 }
   0x4   :  { %15 = vsyncpa [#allocation10], 0 }
   0x5   :  { %16 = vsyncpa [#allocation8], 0 }
   0x6   :  { %17 = vsyncpa [#allocation7], 0  ;;  %s852_s20 = smov 0   ;;  %s854_s21 = smov 0  }
   0x7   :  { %s856_s22 = smov 0   ;;  %s858_s23 = smov 0  }
   0x8   :  { %s860_s24 = smov 0   ;;  %s862_s25 = smov 0  }
   0x9 LB: > { %s519_s0 = sadd.s32 4294967295, %s810_s25   ;;  %p520_p0 = scmp.ge.s32.totalorder %s810_s25, 1  ;;  %s810_s25 = sphi %s862_s25, %s23_s25   ;;  %s806_s24 = sphi %s860_s24, %s1022_s24   ;;  %s802_s23 = sphi %s858_s23, %s1021_s23   ;;  %s798_s22 = sphi %s856_s22, %s1020_s22   ;;  %s794_s21 = sphi %s854_s21, %s1019_s21   ;;  %s790_s20 = sphi %s852_s20, %s1018_s20  }
   0xa   : > { %p886_p1 = scmp.eq.s32.totalorder %s519_s0, 0  ;;  %p173_p2 = scmp.lt.s32.totalorder %s810_s25, 5 }
   0xb   : > { %s187_s29 = sshll.u32 %s1009_s2, 4  ;;  %s812_s6 = smov [#allocation9]   ;;  %s188_s29 = int_to_ptr.hbm [resolvable:$true] %s187_s29 }
   0xc   : > { %p894_p3 = pnand %p520_p0, %p173_p2  ;;  %s189_s7 = sshll.u32 %s812_s6, 4  ;;  %s190_s7 = int_to_ptr.vmem [resolvable:$true] %s189_s7 }
   0xd   : > { %s813_s8 = smov 128   ;;  %s814_s9 = smov 8  }
   0xe   : > { %p559_p4 = pneg %p894_p3  ;;  %s35_s10 = sadd.s32 1, %s806_s24 }
   0xf   : > { %p37_p6 = scmp.ge.s32.totalorder %s35_s10, 4  ;;  %p72_p7 = scmp.ne.s32.totalorder %s798_s22, %s794_s21 }
  0x10   : > { %p560_p5 = pnand %p559_p4, %p886_p1  ;;  %p73_p8 = scmp.eq.s32.totalorder %s810_s25, 0 }
  0x11   : > { %s1024_s10 = smov (%p37_p6, %s35_s10), 0  ;;  %s65_s11 = sadd.s32 1, %s798_s22 }
  0x12   : > { %562 = dma.hbm_to_vmem [thread:$0]  (!%p560_p5), %s188_s29, 256, %s190_s7, [#allocation10], %s813_s8, %s813_s8, %s814_s9  }
  0x13   : > { %p78_p9 = scmp.ne.s32.totalorder %s794_s21, %s790_s20  ;;  %s62_s12 = ssub.s32 %s806_s24, %s1024_s10 }
  0x14   : > { %p913_p10 = por %p73_p8, %p72_p7  ;;  %p63_p11 = scmp.eq.s32.totalorder %s62_s12, 0 }
  0x15   : > { %p919_p12 = por %p886_p1, %p78_p9  ;;  %s206_s15 = sand.u32 1, %s798_s22  }
  0x16   : > { %s524_s16 = sshll.u32 %s806_s24, 3  ;;  %p568_p13 = scmp.lt.s32.totalorder %s810_s25, 4 }
  0x17   : > { %s926_s17 = scalar_select %p63_p11, %s798_s22, %s65_s11  }
  0x18   : > { %s523_s18 = sshll.u32 %s206_s15, 3  ;;  %s215_s27 = scalar_lea.hbm %s1008_s1, %s524_s16 }
  0x19   : > { %s217_s28 = sshll.u32 %s215_s27, 4  ;;  %s210_s29 = scalar_lea.vmem [#allocation5], %s523_s18  ;;  %s218_s28 = int_to_ptr.hbm [resolvable:$true] %s217_s28 }
  0x1a   : > { %s219_s6 = sshll.u32 %s210_s29, 4  ;;  %p564_p0 = pnand %p568_p13, %p913_p10  ;;  %s220_s6 = int_to_ptr.vmem [resolvable:$true] %s219_s6 }
  0x1b   : > { %s207_s7 = scalar_lea.sflag [#allocation6], %s206_s15  ;;  %228 = sbr.rel (%p894_p3) target bundleno = 847 (0x34f), region = 36 }
  0x1c   : > { %566 = dma.hbm_to_vmem [thread:$0]  (!%p564_p0), %s218_s28, 128, %s220_s6, %s207_s7  }
  0x1d   : > { %s230_s8 = sand.u32 (!%p894_p3), 1, %s794_s21  }
  0x1e   : > { %s937_s9 = sshll.u32 (!%p894_p3), %s230_s8, 3  ;;  %s231_s11 = scalar_lea.sflag (!%p894_p3), [#allocation6], %s230_s8 }
  0x1f   : > { %s234_s12 = scalar_lea.vmem (!%p894_p3), [#allocation5], %s937_s9 }
  0x20   : > { %773 = dma.done.wait (%p919_p12), %s231_s11, 128  }
  0x21   : > { %775 = vsyncadd (%p919_p12), %s231_s11, 4294967168 }
  0x22   : > { %777 = dma.done.wait (%p886_p1), [#allocation10], 256  }
  0x23   : > { %779 = vsyncadd (%p886_p1), [#allocation10], 4294967040  ;;  %p263_p2 = scmp.eq.s32.totalorder %s802_s23, 0  ;;  %p267_p3 = scmp.eq.s32.totalorder %s802_s23, 3 }
  0x24   : > { %s274_s30 = sld [smem:[#allocation4]] (%p263_p2)  ;;  %s815_s13 = smov (%p263_p2), 0.0   ;;  %v291_v11 = vld [vmem:[#allocation9] sm:$0xff] (%p263_p2)  ;;  %v292_v12 = vld [vmem:[#allocation9 + $0x8] sm:$0xff] (%p263_p2)  ;;  %v293_v19 = vld [vmem:[%s1010_s3] sm:$0x1] (%p263_p2) }
  0x25   : > { %271 = sbr.rel (!%p263_p2) target bundleno = 386 (0x182), region = 48  ;;  %273 = sst [smem:[#allocation3]] (%p263_p2), %s815_s13  ;;  %v350_v13 = vadd.f32 (%p263_p2), %v292_v12, %v291_v11  ;;  %v358_v22 = vmul.f32 (%p263_p2), 0.9, %v293_v19  ;;  %v629_v25 = vld [vmem:[%s1010_s3] ss:$0 sm:$0xff] (%p263_p2) }
  0x26   : > { %v297_v26 = vsub.f32 (%p263_p2), %v291_v11, %v629_v25  ;;  %v298_v29 = vsub.f32 (%p263_p2), %v292_v12, %v629_v25 }
  0x27   : > { %v351_v14 = vrot.slane (%p263_p2), %v350_v13, 4 }
  0x29   : > { %v352_v15 = vadd.f32 (%p263_p2), %v351_v14, %v350_v13 }
  0x2a   : > { %v275_v0 = vstv %s274_s30 }
  0x2b   : > { %630 = vrcp.f32 %v275_v0  ;;  %v287_v3 = vand.u32 2147483648, %v275_v0  ;;  %vm281_vm0 = vweird.f32 %v275_v0  ;;  %v285_v5 = vand.u32 2147483647, %v275_v0 }
  0x2c   : > { %v353_v16 = vrot.slane %v352_v15, 2 }
  0x2d   : > { %v288_v7 = vor.u32 1.1754944e-38, %v287_v3  ;;  %vm286_vm3 = vcmp.eq.f32.partialorder %v285_v5, 8.507059e+37 }
  0x2e   : > { %v354_v17 = vadd.f32 %v353_v16, %v352_v15 }
  0x30   : > { %v355_v18 = vrot.slane %v354_v17, 1 }
  0x31   : > { %v631_v1 = vpop.eup %630 }
  0x32   : > { %v277_v2 = vmul.f32 %v631_v1, %v275_v0  ;;  %vm282_vm1 = vweird.f32 %v631_v1  ;;  %v356_v20 = vadd.f32 %v355_v18, %v354_v17 }
  0x33   : > { %vm283_vm2 = vmor %vm281_vm0, %vm282_vm1 }
  0x34   : > { %v278_v4 = vsub.f32 1.0, %v277_v2  ;;  %v357_v21 = vmul.f32 0.0625, %v356_v20 }
  0x36   : > { %v279_v6 = vmul.f32 %v631_v1, %v278_v4  ;;  %v359_v23 = vmul.f32 0.1, %v357_v21 }
  0x38   : > { %v280_v8 = vadd.f32 %v631_v1, %v279_v6  ;;  %v360_v24 = vadd.f32 %v359_v23, %v358_v22 }
  0x3a   : > { %v284_v9 = vsel %vm283_vm2, %v631_v1, %v280_v8  ;;  %361 = vst [vmem:[#allocation12] sm:$0x1] %v360_v24 }
  0x3b   : > { %v289_v10 = vsel %vm286_vm3, %v288_v7, %v284_v9 }
  0x3c   : > { %539 = vpush %v289_v10 }
  0x6d   : > { %s540_s18 = spop %539 }
  0x6e   : > { %v299_v27 = vstv %s540_s18 }
  0x6f   : > { %v300_v28 = vmul.f32 %v299_v27, %v297_v26  ;;  %v301_v30 = vmul.f32 %v299_v27, %v298_v29 }
  0x71   : > { %302 = vmax.xlane.f32.xlu0 %v300_v28 }
  0x79   : > { %304 = vmax.xlane.f32.xlu0 %v301_v30 }
  0xe4   : > { %v303_v31 = vpop.xlane.xlu0 %302 }
  0xe5   : > { %v306_v32 = vsub.f32 %v300_v28, %v303_v31 }
  0xe7   : > { %v308_v33 = vmul.f32 1.442695, %v306_v32 }
  0xe9   : > { %632 = vpow2.f32 %v308_v33 }
  0xec   : > { %v305_v34 = vpop.xlane.xlu0 %304 }
  0xed   : > { %v307_v35 = vsub.f32 %v301_v30, %v305_v34 }
  0xef   : > { %v633_v36 = vpop.eup %632  ;;  %v310_v37 = vmul.f32 1.442695, %v307_v35 }
  0xf0   : > { %312 = vadd.xlane.f32.xlu1 %v633_v36 }
  0xf1   : > { %634 = vpow2.f32 %v310_v37 }
  0xf7   : > { %v635_v38 = vpop.eup %634 }
  0xf8   : > { %314 = vadd.xlane.f32.xlu1 %v635_v38 }
 0x163   : > { %v313_v39 = vpop.xlane.xlu1 %312 }
 0x164   : > { %636 = vrcp.f32 %v313_v39  ;;  %v327_v44 = vand.u32 2147483648, %v313_v39  ;;  %v325_v46 = vand.u32 2147483647, %v313_v39  ;;  %vm321_vm5 = vweird.f32 %v313_v39 }
 0x166   : > { %v328_v49 = vor.u32 1.1754944e-38, %v327_v44  ;;  %vm326_vm7 = vcmp.eq.f32.partialorder %v325_v46, 8.507059e+37 }
 0x16a   : > { %v637_v40 = vpop.eup %636 }
 0x16b   : > { %v317_v41 = vmul.f32 %v637_v40, %v313_v39  ;;  %v315_v42 = vpop.xlane.xlu1 %314  ;;  %vm322_vm4 = vweird.f32 %v637_v40 }
 0x16c   : > { %638 = vrcp.f32 %v315_v42  ;;  %vm323_vm6 = vmor %vm321_vm5, %vm322_vm4  ;;  %v341_v55 = vand.u32 2147483648, %v315_v42  ;;  %v339_v57 = vand.u32 2147483647, %v315_v42  ;;  %vm335_vm9 = vweird.f32 %v315_v42 }
 0x16d   : > { %v318_v43 = vsub.f32 1.0, %v317_v41 }
 0x16e   : > { %v342_v59 = vor.u32 1.1754944e-38, %v341_v55  ;;  %vm340_vm11 = vcmp.eq.f32.partialorder %v339_v57, 8.507059e+37 }
 0x16f   : > { %v319_v45 = vmul.f32 %v637_v40, %v318_v43 }
 0x171   : > { %v320_v47 = vadd.f32 %v637_v40, %v319_v45 }
 0x172   : > { %v639_v48 = vpop.eup %638 }
 0x173   : > { %v324_v50 = vsel %vm323_vm6, %v637_v40, %v320_v47  ;;  %v331_v51 = vmul.f32 %v639_v48, %v315_v42  ;;  %vm336_vm8 = vweird.f32 %v639_v48 }
 0x174   : > { %v329_v52 = vsel %vm326_vm7, %v328_v49, %v324_v50  ;;  %vm337_vm10 = vmor %vm335_vm9, %vm336_vm8 }
 0x175   : > { %v344_v53 = vmul.f32 %v633_v36, %v329_v52  ;;  %v332_v54 = vsub.f32 1.0, %v331_v51 }
 0x177   : > { %346 = vst [vmem:[#allocation2] sm:$0xff] %v344_v53  ;;  %v333_v56 = vmul.f32 %v639_v48, %v332_v54 }
 0x179   : > { %v334_v58 = vadd.f32 %v639_v48, %v333_v56 }
 0x17b   : > { %v338_v60 = vsel %vm337_vm10, %v639_v48, %v334_v58 }
 0x17c   : > { %v343_v61 = vsel %vm340_vm11, %v342_v59, %v338_v60 }
 0x17d   : > { %v345_v62 = vmul.f32 %v635_v38, %v343_v61 }
 0x17f   : > { %347 = vst [vmem:[#allocation2 + $0x8] sm:$0xff] %v345_v62  ;;  %v348_v63 = vadd.f32 %v345_v62, %v344_v53 }
 0x181   : > { %349 = vst [vmem:[#allocation2 + $0x10] sm:$0xff] %v348_v63 }
 0x182 PF: > { %v362_v0 = vld [vmem:[%s234_s12] sm:$0xff]  ;;  %p374_p1 = scmp.eq.s32.totalorder %s802_s23, 1  ;;  %s382_s28 = sld [smem:[#allocation3]]  ;;  %v816_v19 = vmov (%p267_p3), 48.0  }
 0x183   : > { %v363_v1 = vmul.f32 10.0, %v362_v0 }
 0x184   : > { %s375_s19 = scalar_select %p374_p1, 0, 2 }
 0x185   : > { %364 = vmax.xlane.f32.xlu0 %v363_v1 }
 0x186   : > { %s1026_s19 = smov (%p263_p2, %s375_s19), 1 }
 0x187   : > { %s530_s20 = sshll.u32 %s1026_s19, 3 }
 0x188   : > { %s380_s27 = scalar_lea.vmem [#allocation2], %s530_s20 }
 0x189   : > { %v381_v9 = vld [vmem:[%s380_s27] sm:$0xff] }
 0x1f8   : > { %v365_v2 = vpop.xlane.xlu0 %364 }
 0x1f9   : > { %v366_v3 = vsub.f32 %v363_v1, %v365_v2 }
 0x1fb   : > { %v367_v4 = vmul.f32 1.442695, %v366_v3 }
 0x1fd   : > { %640 = vpow2.f32 %v367_v4 }
 0x203   : > { %v641_v5 = vpop.eup %640 }
 0x204   : > { %369 = vadd.xlane.f32.xlu0 %v641_v5 }
 0x277   : > { %v370_v6 = vpop.xlane.xlu0 %369 }
 0x278   : > { %642 = vlog2.f32 %v370_v6 }
 0x279   : > { %644 = vrcp.f32 (%p267_p3), %v816_v19 }
 0x27e   : > { %v643_v7 = vpop.eup %642 }
 0x27f   : > { %v372_v8 = vmul.f32 0.6931472, %v643_v7  ;;  %v645_v20 = vpop.eup (%p267_p3), %644 }
 0x280   : > { %v401_v21 = vmul.f32 (%p267_p3), 48.0, %v645_v20  ;;  %vm405_vm12 = vweird.f32 (%p267_p3), %v645_v20 }
 0x281   : > { %v373_v10 = vsub.f32 %v366_v3, %v372_v8 }
 0x282   : > { %v402_v22 = vsub.f32 (%p267_p3), 1.0, %v401_v21 }
 0x283   : > { %v383_v11 = vmul.f32 %v381_v9, %v373_v10 }
 0x284   : > { %v403_v23 = vmul.f32 (%p267_p3), %v645_v20, %v402_v22 }
 0x285   : > { %384 = vadd.xlane.f32.xlu1 %v383_v11 }
 0x286   : > { %v404_v24 = vadd.f32 (%p267_p3), %v645_v20, %v403_v23 }
 0x288   : > { %v406_v25 = vsel (%p267_p3), %vm405_vm12, %v645_v20, %v404_v24 }
 0x2f8   : > { %v385_v12 = vpop.xlane.xlu1 %384 }
 0x2f9   : > { %v386_v13 = vrot.slane %v385_v12, 4 }
 0x2fb   : > { %v387_v14 = vadd.f32 %v386_v13, %v385_v12 }
 0x2fd   : > { %v388_v15 = vrot.slane %v387_v14, 2 }
 0x2ff   : > { %v389_v16 = vadd.f32 %v388_v15, %v387_v14 }
 0x301   : > { %v390_v17 = vrot.slane %v389_v16, 1 }
 0x303   : > { %v391_v18 = vadd.f32 %v390_v17, %v389_v16 }
 0x305   : > { %541 = vpush %v391_v18 }
 0x306   : > { %543 = vpush (%p267_p3), %v406_v25 }
 0x335   : > { %397 = sbr.rel (!%p267_p3) target bundleno = 837 (0x345), region = 52 }
 0x336   : > { %s542_s29 = spop %541 }
 0x337   : > { %s393_s6 = sadd.f32 %s542_s29, %s382_s28  ;;  %s544_s9 = spop (%p267_p3), %543 }
 0x339   : > { %395 = sst [smem:[#allocation3]] %s393_s6 }
 0x33a   : > { %s398_s7 = sld [smem:[#allocation3]] }
 0x340   : > { %s399_s8 = ssub.f32 0.0, %s398_s7 }
 0x342   : > { %s408_s11 = smul.f32 %s544_s9, %s399_s8 }
 0x344   : > { %410 = sst [smem:[#allocation11]] %s408_s11 }
 0x345 PF: > { %p967_p4 = scmp.eq.s32.totalorder %s519_s0, 3  ;;  %s417_s13 = sshll.u32 %s1011_s4, 4  ;;  %s418_s13 = int_to_ptr.hbm [resolvable:$true] %s417_s13 }
 0x346   : > { %s817_s26 = smov [#allocation11]   ;;  %s818_s14 = smov [#allocation12]  }
 0x347   : > { %552 = dma.smem_to_hbm (%p967_p4), %s817_s26, 16, %s418_s13, [#allocation8]  }
 0x348   : > { %s427_s15 = sshll.u32 %s818_s14, 4  ;;  %s429_s0 = sshll.u32 %s1012_s5, 4  ;;  %s428_s15 = int_to_ptr.vmem [resolvable:$true] %s427_s15  ;;  %s430_s0 = int_to_ptr.hbm [resolvable:$true] %s429_s0 }
 0x349   : > { %554 = dma.vmem_to_hbm [thread:$0]  (%p967_p4), %s428_s15, 16, %s430_s0, [#allocation7]  }
 0x34a   : > { %781 = dma.done.wait (%p967_p4), [#allocation8], 16  }
 0x34b   : > { %783 = vsyncadd (%p967_p4), [#allocation8], 4294967280 }
 0x34c   : > { %785 = dma.done.wait (%p967_p4), [#allocation7], 16  }
 0x34d   : > { %787 = vsyncadd (%p967_p4), [#allocation7], 4294967280 }
 0x34e   : > { %443 = sfence }
 0x34f PF: > { %s23_s25 = sadd.s32 1, %s810_s25   ;;  %s1018_s20 = smov %s794_s21 }
 0x350   : > { %p20_p5 = scmp.ge.s32.totalorder %s23_s25, 6   ;;  %s1019_s21 = smov %s798_s22 }
 0x351   : > { %s1020_s22 = smov %s926_s17  ;;  %s1021_s23 = smov %s806_s24 }
 0x352   : > { %s1022_s24 = smov %s1024_s10  ;;  %22 = sbr.rel (!%p20_p5) target bundleno = 9 (0x9), region = 98 }
 0x357   :  { %449 = vsyncpa [#allocation6], 1 }
 0x358   :  { %451 = vsyncpa [#allocation6 + $0x1], 1 }
 0x359   :  { %452 = vsyncpa [#allocation10], 1 }
 0x35a   :  { %453 = vsyncpa [#allocation7], 1 }
 0x35b   :  { %455 = vsyncpa [#allocation7 + $0x1], 1 }
 0x35c   :  { %456 = vsyncpa [#allocation8], 1 }
 0x35d   :  { %458 = vsyncpa [#allocation8 + $0x1], 1 }

</bundles_post_ra>
